<compile_context>
chip_gen: v5e
topology: v5e:2x2
jax: 0.10.0
libtpu: 0.0.40
codegen_flags: <defaults>
</compile_context>

<pallas_src>
import jax
import jax.numpy as jnp
from jax.experimental import pallas as pl
from jax.experimental.pallas import tpu as pltpu


_LANE = 128


def _round_up(x, m):
    return (x + m - 1) // m * m


def _pick_tile(total, preferred, align):
    """Tile size for a dim of length `total`.

    Returns `total` itself if it fits within `preferred` (a full-dim block is
    always legal).  Otherwise the largest multiple of `align` <= `preferred`
    that evenly divides `total` (so no padding is needed), or None if there is
    no such divisor (caller falls back to padding).
    """
    if total <= preferred:
        return total
    t = (preferred // align) * align
    while t >= align:
        if total % t == 0:
            return t
        t -= align
    return None


# --------------------------------------------------------------------------
# Kernels
# --------------------------------------------------------------------------

def _hebb_single_block_kernel(x_ref, w_ref, o_ref):
    # Whole problem in one MXU pass: out = X @ W.  No padding anywhere; the
    # (B, N) store may be masked, which is negligible at these sizes.
    o_ref[...] = jnp.dot(
        x_ref[...], w_ref[...], preferred_element_type=jnp.float32
    ).astype(o_ref.dtype)


def _hebb_tiled_kernel(x_ref, w_ref, o_ref):
    # Grid = (M tiles, N tiles, K tiles); K is last (reduction, "arbitrary").
    # The output block index is constant along K, so o_ref stays VMEM-resident
    # across the K sweep; accumulate directly into it (output is f32).
    k = pl.program_id(2)

    @pl.when(k == 0)
    def _():
        o_ref[...] = jnp.zeros_like(o_ref)

    o_ref[...] += jnp.dot(
        x_ref[...], w_ref[...], preferred_element_type=jnp.float32
    )


# --------------------------------------------------------------------------
# Wrapper
# --------------------------------------------------------------------------

class HebbPallas:
    """Pallas implementation of Hebb.forward with weight prep hoisted to init."""

    def __init__(self, weight, *, small_path_vmem_budget=12 * 1024 * 1024,
                 tm=None, tn=512, tk=1024):
        w = jnp.asarray(weight, jnp.float32)      # cast once (no-op if f32)
        self.K, self.N = w.shape
        self.w = w                                # unpadded f32 weight (small path)
        self.small_budget = small_path_vmem_budget
        self.tm_pref = tm                         # None -> auto per batch size
        self.tn_pref = tn
        self.tk_pref = tk
        self._tiled_cache = None                  # lazily built, reused each call

    # -- tiled-path weight prep: done once, cached -------------------------
    def _tiled_weight(self):
        if self._tiled_cache is None:
            n_pad = _round_up(self.N, _LANE)
            tk_eff = _pick_tile(self.K, self.tk_pref, _LANE)
            if tk_eff is None:
                # TODO(synk): ragged-K masking inside the kernel would avoid
                # this padding; it only triggers when K > tk and K has no
                # 128-aligned divisor <= tk.
                tk_eff = self.tk_pref
                k_pad = _round_up(self.K, tk_eff)
            else:
                k_pad = self.K
            w = self.w
            if k_pad != self.K or n_pad != self.N:
                w = jnp.pad(w, ((0, k_pad - self.K), (0, n_pad - self.N)))
            self._tiled_cache = (w, n_pad, k_pad, tk_eff)
        return self._tiled_cache

    # -- forward ------------------------------------------------------------
    def __call__(self, x_nchw):
        b = x_nchw.shape[0]
        x2d = x_nchw.reshape(b, -1).astype(jnp.float32)  # == torch flatten(1)
        K, N = self.K, self.N
        assert x2d.shape[1] == K, "weight rows must equal C*H*W"

        # Working set including double-buffered input allocations (~2x), so the
        # threshold is honest w.r.t. v5e's 16 MiB scoped-VMEM default.
        vmem_need = 2 * 4 * (b * K + K * N + b * N)

        if vmem_need <= self.small_budget:
            # ---- Small-problem path: one grid step, full-array blocks, no pad.
            cost = pl.CostEstimate(
                flops=2 * b * K * N,
                transcendentals=0,
                bytes_accessed=4 * (b * K + K * N + b * N),
            )
            return pl.pallas_call(
                _hebb_single_block_kernel,
                out_shape=jax.ShapeDtypeStruct((b, N), jnp.float32),
                grid_spec=pltpu.PrefetchScalarGridSpec(
                    num_scalar_prefetch=0,
                    grid=(1,),
                    in_specs=[
                        pl.BlockSpec((b, K), lambda i: (0, 0)),   # X (B, K)
                        pl.BlockSpec((K, N), lambda i: (0, 0)),   # W (K, N)
                    ],
                    out_specs=pl.BlockSpec((b, N), lambda i: (0, 0)),
                ),
                compiler_params=pltpu.CompilerParams(
                    dimension_semantics=("arbitrary",),
                ),
                cost_estimate=cost,
            )(x2d, self.w)

        # ---- General / large path: M/N/K tiling, K last. ----
        w, n_pad, k_pad, tk = self._tiled_weight()

        if k_pad != K:
            # Fallback only (K has no aligned divisor <= tk) — see TODO above.
            x2d = jnp.pad(x2d, ((0, 0), (0, k_pad - K)))

        # M tiling: never pad small batches; prefer divisors for big ones.
        tm_pref = self.tm_pref or (256 if b >= 256 else 128)
        if b <= tm_pref:
            tm_eff, m_pad = b, b
        else:
            t = _pick_tile(b, tm_pref, 8)
            if t is None:
                tm_eff = tm_pref
                m_pad = _round_up(b, tm_eff)
                x2d = jnp.pad(x2d, ((0, m_pad - b), (0, 0)))
            else:
                tm_eff, m_pad = t, b
        m_tiles = m_pad // tm_eff

        # N tiling: largest 128-multiple <= tn_pref dividing n_pad; if the M
        # grid has a single tile, keep >=2 N tiles when possible so both v7x
        # TensorCores get work.
        cands = [t for t in range(_LANE, min(self.tn_pref, n_pad) + 1, _LANE)
                 if n_pad % t == 0]
        tn = max(cands)
        if m_tiles == 1 and n_pad // tn < 2:
            two_tile = [t for t in cands if n_pad // t >= 2]
            if two_tile:
                tn = max(two_tile)
        n_tiles = n_pad // tn
        k_tiles = k_pad // tk

        # Explicit VMEM limit from the actual tile working set (double-buffered
        # inputs + output block), kept well under v7x's 64 MiB physical VMEM.
        tile_bytes = 4 * (2 * tm_eff * tk + 2 * tk * tn + 2 * tm_eff * tn)
        vmem_limit = int(min(max(tile_bytes + (4 << 20), 16 << 20), 48 << 20))

        cost = pl.CostEstimate(
            flops=2 * m_pad * k_pad * n_pad,
            transcendentals=0,
            bytes_accessed=4 * (m_pad * k_pad + k_pad * n_pad + m_pad * n_pad),
        )

        out_padded = pl.pallas_call(
            _hebb_tiled_kernel,
            out_shape=jax.ShapeDtypeStruct((m_pad, n_pad), jnp.float32),
            grid_spec=pltpu.PrefetchScalarGridSpec(
                num_scalar_prefetch=0,
                grid=(m_tiles, n_tiles, k_tiles),
                in_specs=[
                    pl.BlockSpec((tm_eff, tk), lambda i, j, k: (i, k)),  # X tile
                    pl.BlockSpec((tk, tn), lambda i, j, k: (k, j)),      # W tile
                ],
                out_specs=pl.BlockSpec((tm_eff, tn), lambda i, j, k: (i, j)),
            ),
            compiler_params=pltpu.CompilerParams(
                dimension_semantics=("parallel", "parallel", "arbitrary"),
                vmem_limit_bytes=vmem_limit,
            ),
            cost_estimate=cost,
        )(x2d, w)

        if m_pad != b or n_pad != N:
            out_padded = out_padded[:b, :N]
        return out_padded


def hebb_forward(x_nchw, weight, **kwargs):
    """One-shot functional wrapper (prefer HebbPallas for repeated calls)."""
    return HebbPallas(weight, **kwargs)(x_nchw)


if __name__ == "__main__":
    # Small shapes consistent with the module: batch=2, channels=4, spatial=16.
    B, C, H, W = 2, 4, 16, 16
    N = 10                        # output_size
    K = C * H * W                 # input_size = 1024

    key = jax.random.PRNGKey(0)
    kx, kw = jax.random.split(key)
    x = jax.random.normal(kx, (B, C, H, W), dtype=jnp.float32)
    # Module __init__ sets weight = zeros(input_size, output_size); that makes a
    # trivially-zero forward, so initialize it deterministically with random
    # values of the same shape/dtype to exercise the kernel.
    weight = jax.random.normal(kw, (K, N), dtype=jnp.float32) * 0.01

    ref = x.reshape(B, -1) @ weight

    # 1) Default (single-block, unpadded) path — the one used at these shapes.
    hebb = HebbPallas(weight)
    out = jax.block_until_ready(hebb(x))
    assert out.shape == (B, N)
    assert jnp.allclose(out, ref, atol=1e-4, rtol=1e-4)

    # 2) Force the tiled M/N/K path too, to validate the general kernel on TPU
    #    (weight padding for this path happens once and is cached).
    hebb_tiled = HebbPallas(weight, small_path_vmem_budget=0)
    out_tiled = jax.block_until_ready(hebb_tiled(x))
    assert out_tiled.shape == (B, N)
    assert jnp.allclose(out_tiled, ref, atol=1e-4, rtol=1e-4)
    # Second call reuses the cached padded weight (no per-call jnp.pad of W).
    out_tiled2 = jax.block_until_ready(hebb_tiled(x))
    assert jnp.allclose(out_tiled2, ref, atol=1e-4, rtol=1e-4)

    print("KERNEL_OK")
</pallas_src>

<mosaic_0001>
module attributes {stable_mosaic.version = 11 : i64} {
  func.func @_hebb_single_block_kernel(%arg0: i32, %arg1: memref<2x1024xf32, #tpu.memory_space<vmem>>, %arg2: memref<1024x10xf32, #tpu.memory_space<vmem>>, %arg3: memref<2x10xf32, #tpu.memory_space<vmem>>) attributes {dimension_semantics = [#tpu.dimension_semantics<arbitrary>], iteration_bounds = array<i64: 1>, scalar_prefetch = 0 : i64, scratch_operands = 0 : i64, tpu.core_type = #tpu.core_type<tc>, window_params = [{pipeline_mode = #tpu.pipeline_mode<synchronous>, transform_indices = @transform_0, window_bounds = array<i64: 2, 1024>}, {pipeline_mode = #tpu.pipeline_mode<synchronous>, transform_indices = @transform_1, window_bounds = array<i64: 1024, 10>}, {pipeline_mode = #tpu.pipeline_mode<synchronous>, transform_indices = @transform_2, window_bounds = array<i64: 2, 10>}]} {
    %c0 = arith.constant 0 : index
    %c0_0 = arith.constant 0 : index
    %0 = vector.load %arg1[%c0, %c0_0] : memref<2x1024xf32, #tpu.memory_space<vmem>>, vector<2x1024xf32>
    %c0_1 = arith.constant 0 : index
    %c0_2 = arith.constant 0 : index
    %1 = vector.load %arg2[%c0_1, %c0_2] : memref<1024x10xf32, #tpu.memory_space<vmem>>, vector<1024x10xf32>
    %cst = arith.constant dense<0.000000e+00> : vector<2x10xf32>
    %2 = tpu.matmul %0, %1, %cst {dimension_numbers = #tpu.dot_dimension_numbers<[1], [0], [0], [1], [0, 0, 1, 1], [], []>} : vector<2x1024xf32>, vector<1024x10xf32>, vector<2x10xf32> -> vector<2x10xf32>
    %c0_3 = arith.constant 0 : index
    %c0_4 = arith.constant 0 : index
    %3 = vector.load %arg3[%c0_3, %c0_4] : memref<2x10xf32, #tpu.memory_space<vmem>>, vector<2x10xf32>
    tpu.vector_store %arg3[%c0_3, %c0_4], %2 {strides = array<i32>} : memref<2x10xf32, #tpu.memory_space<vmem>>, vector<2x10xf32>,
    return
  }
  func.func @transform_0(%arg0: i32) -> (i32, i32) {
    %c0_i32 = arith.constant 0 : i32
    %c0_i32_0 = arith.constant 0 : i32
    %c0_i32_1 = arith.constant 0 : i32
    return %c0_i32, %c0_i32_0 : i32, i32
  }
  func.func @transform_1(%arg0: i32) -> (i32, i32) {
    %c0_i32 = arith.constant 0 : i32
    %c0_i32_0 = arith.constant 0 : i32
    %c0_i32_1 = arith.constant 0 : i32
    return %c0_i32, %c0_i32_0 : i32, i32
  }
  func.func @transform_2(%arg0: i32) -> (i32, i32) {
    %c0_i32 = arith.constant 0 : i32
    %c0_i32_0 = arith.constant 0 : i32
    %c0_i32_1 = arith.constant 0 : i32
    return %c0_i32, %c0_i32_0 : i32, i32
  }
}

</mosaic_0001>

<bundles_post_ra>
// kernel: tpu_custom_call.1
= control target key start
LH: loop header
LB: loop body
LE: loop exit
PB: predicated region body
PF: predicated region fallthrough
CT: control target
= control target key end

     0   :  { %s777_s0 = inlined_call_operand.vmem [shape: f32[2,1024], index: 0, kind: input, shape index: {}]   ;;  %s778_s1 = inlined_call_operand.vmem [shape: f32[1024,10], index: 1, kind: input, shape index: {}]   ;;  %s779_s2 = inlined_call_operand.hbm [shape: f32[2,10], index: 2, kind: output, shape index: {}]  }
   0x1   :  { %v29_v0 = vld [vmem:[%s778_s1 + $0x78] sm:$0xff]  ;;  %v28_v2 = vld [vmem:[%s778_s1 + $0x70] sm:$0xff]  ;;  %v27_v6 = vld [vmem:[%s778_s1 + $0x68] sm:$0xff] }
   0x2   :  { %v61_v1 = vld [vmem:[%s778_s1 + $0x178] sm:$0xff]  ;;  %163 = vmatpush.msra.mxu0 %v29_v0  ;;  %v60_v4 = vld [vmem:[%s778_s1 + $0x170] sm:$0xff]  ;;  %v59_v8 = vld [vmem:[%s778_s1 + $0x168] sm:$0xff] }
   0x3   :  { %203 = vmatpush.msra.mxu2 %v61_v1  ;;  %v45_v3 = vld [vmem:[%s778_s1 + $0xf8] sm:$0xff]  ;;  %v44_v7 = vld [vmem:[%s778_s1 + $0xf0] sm:$0xff]  ;;  %v43_v10 = vld [vmem:[%s778_s1 + $0xe8] sm:$0xff] }
   0x4   :  { %v77_v5 = vld [vmem:[%s778_s1 + $0x1f8] sm:$0xff]  ;;  %183 = vmatpush.msra.mxu1 %v45_v3  ;;  %164 = vmatpush.msra.mxu0 %v28_v2  ;;  %v76_v9 = vld [vmem:[%s778_s1 + $0x1f0] sm:$0xff]  ;;  %v26_v11 = vld [vmem:[%s778_s1 + $0x60] sm:$0xff] }
   0x5   :  { %223 = vmatpush.msra.mxu3 %v77_v5  ;;  %204 = vmatpush.msra.mxu2 %v60_v4  ;;  %v58_v12 = vld [vmem:[%s778_s1 + $0x160] sm:$0xff]  ;;  %v75_v13 = vld [vmem:[%s778_s1 + $0x1e8] sm:$0xff]  ;;  %v25_v16 = vld [vmem:[%s778_s1 + $0x58] sm:$0xff] }
   0x6   :  { %184 = vmatpush.msra.mxu1 %v44_v7  ;;  %165 = vmatpush.msra.mxu0 %v27_v6  ;;  %v42_v14 = vld [vmem:[%s778_s1 + $0xe0] sm:$0xff]  ;;  %v57_v17 = vld [vmem:[%s778_s1 + $0x158] sm:$0xff]  ;;  %v24_v20 = vld [vmem:[%s778_s1 + $0x50] sm:$0xff] }
   0x7   :  { %224 = vmatpush.msra.mxu3 %v76_v9  ;;  %205 = vmatpush.msra.mxu2 %v59_v8  ;;  %v74_v15 = vld [vmem:[%s778_s1 + $0x1e0] sm:$0xff]  ;;  %v41_v18 = vld [vmem:[%s778_s1 + $0xd8] sm:$0xff]  ;;  %v56_v21 = vld [vmem:[%s778_s1 + $0x150] sm:$0xff] }
   0x8   :  { %185 = vmatpush.msra.mxu1 %v43_v10  ;;  %166 = vmatpush.msra.mxu0 %v26_v11  ;;  %v73_v19 = vld [vmem:[%s778_s1 + $0x1d8] sm:$0xff]  ;;  %v40_v22 = vld [vmem:[%s778_s1 + $0xd0] sm:$0xff]  ;;  %v23_v24 = vld [vmem:[%s778_s1 + $0x48] sm:$0xff] }
   0x9   :  { %225 = vmatpush.msra.mxu3 %v75_v13  ;;  %206 = vmatpush.msra.mxu2 %v58_v12  ;;  %v72_v23 = vld [vmem:[%s778_s1 + $0x1d0] sm:$0xff]  ;;  %v55_v25 = vld [vmem:[%s778_s1 + $0x148] sm:$0xff]  ;;  %v22_v28 = vld [vmem:[%s778_s1 + $0x40] sm:$0xff] }
   0xa   :  { %186 = vmatpush.msra.mxu1 %v42_v14  ;;  %167 = vmatpush.msra.mxu0 %v25_v16  ;;  %v39_v26 = vld [vmem:[%s778_s1 + $0xc8] sm:$0xff]  ;;  %v54_v29 = vld [vmem:[%s778_s1 + $0x140] sm:$0xff]  ;;  %v21_v32 = vld [vmem:[%s778_s1 + $0x38] sm:$0xff] }
   0xb   :  { %226 = vmatpush.msra.mxu3 %v74_v15  ;;  %207 = vmatpush.msra.mxu2 %v57_v17  ;;  %v71_v27 = vld [vmem:[%s778_s1 + $0x1c8] sm:$0xff]  ;;  %v38_v30 = vld [vmem:[%s778_s1 + $0xc0] sm:$0xff]  ;;  %v53_v33 = vld [vmem:[%s778_s1 + $0x138] sm:$0xff] }
   0xc   :  { %187 = vmatpush.msra.mxu1 %v41_v18  ;;  %168 = vmatpush.msra.mxu0 %v24_v20  ;;  %v70_v31 = vld [vmem:[%s778_s1 + $0x1c0] sm:$0xff]  ;;  %v37_v34 = vld [vmem:[%s778_s1 + $0xb8] sm:$0xff]  ;;  %v20_v36 = vld [vmem:[%s778_s1 + $0x30] sm:$0xff] }
   0xd   :  { %227 = vmatpush.msra.mxu3 %v73_v19  ;;  %208 = vmatpush.msra.mxu2 %v56_v21  ;;  %v69_v35 = vld [vmem:[%s778_s1 + $0x1b8] sm:$0xff]  ;;  %v52_v37 = vld [vmem:[%s778_s1 + $0x130] sm:$0xff]  ;;  %v19_v40 = vld [vmem:[%s778_s1 + $0x28] sm:$0xff] }
   0xe   :  { %188 = vmatpush.msra.mxu1 %v40_v22  ;;  %169 = vmatpush.msra.mxu0 %v23_v24  ;;  %v36_v38 = vld [vmem:[%s778_s1 + $0xb0] sm:$0xff]  ;;  %v51_v41 = vld [vmem:[%s778_s1 + $0x128] sm:$0xff]  ;;  %v18_v44 = vld [vmem:[%s778_s1 + $0x20] sm:$0xff] }
   0xf   :  { %228 = vmatpush.msra.mxu3 %v72_v23  ;;  %209 = vmatpush.msra.mxu2 %v55_v25  ;;  %v68_v39 = vld [vmem:[%s778_s1 + $0x1b0] sm:$0xff]  ;;  %v35_v42 = vld [vmem:[%s778_s1 + $0xa8] sm:$0xff]  ;;  %v50_v45 = vld [vmem:[%s778_s1 + $0x120] sm:$0xff] }
  0x10   :  { %189 = vmatpush.msra.mxu1 %v39_v26  ;;  %170 = vmatpush.msra.mxu0 %v22_v28  ;;  %v67_v43 = vld [vmem:[%s778_s1 + $0x1a8] sm:$0xff]  ;;  %v34_v46 = vld [vmem:[%s778_s1 + $0xa0] sm:$0xff]  ;;  %v17_v48 = vld [vmem:[%s778_s1 + $0x18] sm:$0xff] }
  0x11   :  { %229 = vmatpush.msra.mxu3 %v71_v27  ;;  %210 = vmatpush.msra.mxu2 %v54_v29  ;;  %v66_v47 = vld [vmem:[%s778_s1 + $0x1a0] sm:$0xff]  ;;  %v49_v49 = vld [vmem:[%s778_s1 + $0x118] sm:$0xff]  ;;  %v16_v52 = vld [vmem:[%s778_s1 + $0x10] sm:$0xff] }
  0x12   :  { %190 = vmatpush.msra.mxu1 %v38_v30  ;;  %171 = vmatpush.msra.mxu0 %v21_v32  ;;  %v33_v50 = vld [vmem:[%s778_s1 + $0x98] sm:$0xff]  ;;  %v48_v53 = vld [vmem:[%s778_s1 + $0x110] sm:$0xff]  ;;  %v15_v56 = vld [vmem:[%s778_s1 + $0x8] sm:$0xff] }
  0x13   :  { %230 = vmatpush.msra.mxu3 %v70_v31  ;;  %211 = vmatpush.msra.mxu2 %v53_v33  ;;  %v65_v51 = vld [vmem:[%s778_s1 + $0x198] sm:$0xff]  ;;  %v32_v54 = vld [vmem:[%s778_s1 + $0x90] sm:$0xff]  ;;  %v47_v57 = vld [vmem:[%s778_s1 + $0x108] sm:$0xff] }
  0x14   :  { %191 = vmatpush.msra.mxu1 %v37_v34  ;;  %172 = vmatpush.msra.mxu0 %v20_v36  ;;  %v64_v55 = vld [vmem:[%s778_s1 + $0x190] sm:$0xff]  ;;  %v31_v58 = vld [vmem:[%s778_s1 + $0x88] sm:$0xff]  ;;  %v14_v60 = vld [vmem:[%s778_s1] sm:$0xff] }
  0x15   :  { %231 = vmatpush.msra.mxu3 %v69_v35  ;;  %212 = vmatpush.msra.mxu2 %v52_v37  ;;  %v63_v59 = vld [vmem:[%s778_s1 + $0x188] sm:$0xff]  ;;  %v46_v61 = vld [vmem:[%s778_s1 + $0x100] sm:$0xff]  ;;  %v93_v62 = vld [vmem:[%s778_s1 + $0x278] sm:$0xff] }
  0x16   :  { %192 = vmatpush.msra.mxu1 %v36_v38  ;;  %173 = vmatpush.msra.mxu0 %v19_v40  ;;  %v125_v63 = vld [vmem:[%s778_s1 + $0x378] sm:$0xff]  ;;  %v30_v0 = vld [vmem:[%s778_s1 + $0x80] sm:$0xff]  ;;  %v92_v2 = vld [vmem:[%s778_s1 + $0x270] sm:$0xff] }
  0x17   :  { %232 = vmatpush.msra.mxu3 %v68_v39  ;;  %213 = vmatpush.msra.mxu2 %v51_v41  ;;  %v62_v1 = vld [vmem:[%s778_s1 + $0x180] sm:$0xff]  ;;  %v109_v3 = vld [vmem:[%s778_s1 + $0x2f8] sm:$0xff]  ;;  %v124_v4 = vld [vmem:[%s778_s1 + $0x370] sm:$0xff] }
  0x18   :  { %193 = vmatpush.msra.mxu1 %v35_v42  ;;  %174 = vmatpush.msra.mxu0 %v18_v44  ;;  %v141_v5 = vld [vmem:[%s778_s1 + $0x3f8] sm:$0xff]  ;;  %v91_v6 = vld [vmem:[%s778_s1 + $0x268] sm:$0xff]  ;;  %v108_v7 = vld [vmem:[%s778_s1 + $0x2f0] sm:$0xff] }
  0x19   :  { %233 = vmatpush.msra.mxu3 %v67_v43  ;;  %214 = vmatpush.msra.mxu2 %v50_v45  ;;  %v123_v8 = vld [vmem:[%s778_s1 + $0x368] sm:$0xff]  ;;  %v140_v9 = vld [vmem:[%s778_s1 + $0x3f0] sm:$0xff]  ;;  %v90_v10 = vld [vmem:[%s778_s1 + $0x260] sm:$0xff] }
  0x1a   :  { %194 = vmatpush.msra.mxu1 %v34_v46  ;;  %175 = vmatpush.msra.mxu0 %v17_v48  ;;  %v107_v11 = vld [vmem:[%s778_s1 + $0x2e8] sm:$0xff]  ;;  %v12_v12 = vld [vmem:[%s777_s0] sm:$0xff]  ;;  %v89_v15 = vld [vmem:[%s778_s1 + $0x258] sm:$0xff] }
  0x1b   :  { %234 = vmatpush.msra.mxu3 %v66_v47  ;;  %215 = vmatpush.msra.mxu2 %v49_v49  ;;  %v122_v13 = vld [vmem:[%s778_s1 + $0x360] sm:$0xff]  ;;  %v139_v14 = vld [vmem:[%s778_s1 + $0x3e8] sm:$0xff]  ;;  %144 = vst [vmem:[#allocation1] ss:$4 sm:$0xff] %v12_v12  ;;  %v121_v17 = vld [vmem:[%s778_s1 + $0x358] sm:$0xff] }
  0x1c   :  { %195 = vmatpush.msra.mxu1 %v33_v50  ;;  %176 = vmatpush.msra.mxu0 %v16_v52  ;;  %v106_v16 = vld [vmem:[%s778_s1 + $0x2e0] sm:$0xff]  ;;  %v88_v19 = vld [vmem:[%s778_s1 + $0x250] sm:$0xff]  ;;  %v105_v20 = vld [vmem:[%s778_s1 + $0x2d8] sm:$0xff] }
  0x1d   :  { %235 = vmatpush.msra.mxu3 %v65_v51  ;;  %216 = vmatpush.msra.mxu2 %v48_v53  ;;  %v138_v18 = vld [vmem:[%s778_s1 + $0x3e0] sm:$0xff]  ;;  %v120_v21 = vld [vmem:[%s778_s1 + $0x350] sm:$0xff]  ;;  %v137_v22 = vld [vmem:[%s778_s1 + $0x3d8] sm:$0xff] }
  0x1e   :  { %196 = vmatpush.msra.mxu1 %v32_v54  ;;  %177 = vmatpush.msra.mxu0 %v15_v56  ;;  %v87_v23 = vld [vmem:[%s778_s1 + $0x248] sm:$0xff]  ;;  %v104_v24 = vld [vmem:[%s778_s1 + $0x2d0] sm:$0xff]  ;;  %v86_v28 = vld [vmem:[%s778_s1 + $0x240] sm:$0xff] }
  0x1f   :  { %236 = vmatpush.msra.mxu3 %v64_v55  ;;  %217 = vmatpush.msra.mxu2 %v47_v57  ;;  %v119_v25 = vld [vmem:[%s778_s1 + $0x348] sm:$0xff]  ;;  %v136_v26 = vld [vmem:[%s778_s1 + $0x3d0] sm:$0xff]  ;;  %v118_v30 = vld [vmem:[%s778_s1 + $0x340] sm:$0xff] }
  0x20   :  { %197 = vmatpush.msra.mxu1 %v31_v58  ;;  %178 = vmatpush.msra.mxu0 %v14_v60  ;;  %v13_v27 = vld [vmem:[%s777_s0 + $0x8] sm:$0xff]  ;;  %v85_v32 = vld [vmem:[%s778_s1 + $0x238] sm:$0xff]  ;;  %v102_v33 = vld [vmem:[%s778_s1 + $0x2c0] sm:$0xff] }
  0x21   :  { %237 = vmatpush.msra.mxu3 %v63_v59  ;;  %218 = vmatpush.msra.mxu2 %v46_v61  ;;  %v103_v29 = vld [vmem:[%s778_s1 + $0x2c8] sm:$0xff]  ;;  %146 = vst [vmem:[#allocation1 + $0x20] ss:$4 sm:$0xff] %v13_v27 }
  0x22   :  { %243 = vmatpush.msrb.mxu0 %v93_v62  ;;  %198 = vmatpush.msra.mxu1 %v30_v0  ;;  %v135_v31 = vld [vmem:[%s778_s1 + $0x3c8] sm:$0xff] }
  0x23   :  { %283 = vmatpush.msrb.mxu2 %v125_v63  ;;  %238 = vmatpush.msra.mxu3 %v62_v1 }
  0x24   :  { %244 = vmatpush.msrb.mxu0 %v92_v2  ;;  %263 = vmatpush.msrb.mxu1 %v109_v3 }
  0x25   :  { %284 = vmatpush.msrb.mxu2 %v124_v4  ;;  %303 = vmatpush.msrb.mxu3 %v141_v5 }
  0x26   :  { %245 = vmatpush.msrb.mxu0 %v91_v6  ;;  %264 = vmatpush.msrb.mxu1 %v108_v7 }
  0x27   :  { %285 = vmatpush.msrb.mxu2 %v123_v8  ;;  %304 = vmatpush.msrb.mxu3 %v140_v9 }
  0x28   :  { %246 = vmatpush.msrb.mxu0 %v90_v10  ;;  %265 = vmatpush.msrb.mxu1 %v107_v11 }
  0x29   :  { %286 = vmatpush.msrb.mxu2 %v122_v13  ;;  %305 = vmatpush.msrb.mxu3 %v139_v14 }
  0x2a   :  { %247 = vmatpush.msrb.mxu0 %v89_v15  ;;  %266 = vmatpush.msrb.mxu1 %v106_v16 }
  0x2b   :  { %287 = vmatpush.msrb.mxu2 %v121_v17  ;;  %306 = vmatpush.msrb.mxu3 %v138_v18 }
  0x2c   :  { %248 = vmatpush.msrb.mxu0 %v88_v19  ;;  %267 = vmatpush.msrb.mxu1 %v105_v20 }
  0x2d   :  { %288 = vmatpush.msrb.mxu2 %v120_v21  ;;  %307 = vmatpush.msrb.mxu3 %v137_v22 }
  0x2e   :  { %249 = vmatpush.msrb.mxu0 %v87_v23  ;;  %268 = vmatpush.msrb.mxu1 %v104_v24 }
  0x2f   :  { %289 = vmatpush.msrb.mxu2 %v119_v25  ;;  %308 = vmatpush.msrb.mxu3 %v136_v26 }
  0x30   :  { %7 = vsyncpa [#allocation3], 0  ;;  %250 = vmatpush.msrb.mxu0 %v86_v28  ;;  %269 = vmatpush.msrb.mxu1 %v103_v29  ;;  %v117_v34 = vld [vmem:[%s778_s1 + $0x338] sm:$0xff]  ;;  %v134_v35 = vld [vmem:[%s778_s1 + $0x3c0] sm:$0xff]  ;;  %s332_s17 = sshll.u32 %s779_s2, 4  ;;  %vm323_vm0 = vcmask 74752   ;;  %s333_s17 = int_to_ptr.hbm [resolvable:$true] %s332_s17 }
  0x31   :  { %290 = vmatpush.msrb.mxu2 %v118_v30  ;;  %309 = vmatpush.msrb.mxu3 %v135_v31  ;;  %v84_v36 = vld [vmem:[%s778_s1 + $0x230] sm:$0xff]  ;;  %v101_v37 = vld [vmem:[%s778_s1 + $0x2b8] sm:$0xff]  ;;  %v83_v40 = vld [vmem:[%s778_s1 + $0x228] sm:$0xff] }
  0x32   :  { %251 = vmatpush.msrb.mxu0 %v85_v32  ;;  %270 = vmatpush.msrb.mxu1 %v102_v33  ;;  %v116_v38 = vld [vmem:[%s778_s1 + $0x330] sm:$0xff]  ;;  %v133_v39 = vld [vmem:[%s778_s1 + $0x3b8] sm:$0xff]  ;;  %v115_v42 = vld [vmem:[%s778_s1 + $0x328] sm:$0xff] }
  0x33   :  { %291 = vmatpush.msrb.mxu2 %v117_v34  ;;  %310 = vmatpush.msrb.mxu3 %v134_v35  ;;  %v100_v41 = vld [vmem:[%s778_s1 + $0x2b0] sm:$0xff]  ;;  %v82_v45 = vld [vmem:[%s778_s1 + $0x220] sm:$0xff]  ;;  %v99_v46 = vld [vmem:[%s778_s1 + $0x2a8] sm:$0xff] }
  0x34   :  { %252 = vmatpush.msrb.mxu0 %v84_v36  ;;  %271 = vmatpush.msrb.mxu1 %v101_v37  ;;  %v132_v43 = vld [vmem:[%s778_s1 + $0x3b0] sm:$0xff]  ;;  %v114_v47 = vld [vmem:[%s778_s1 + $0x320] sm:$0xff]  ;;  %v131_v48 = vld [vmem:[%s778_s1 + $0x3a8] sm:$0xff] }
  0x35   :  { %292 = vmatpush.msrb.mxu2 %v116_v38  ;;  %311 = vmatpush.msrb.mxu3 %v133_v39  ;;  %v149_v44 = vld.sshfl [vmem:[#allocation1 + $0x10] sm:$0xff pattern:$0x73625140]  ;;  %v147_v49 = vld.sshfl [vmem:[#allocation1] sm:$0xff pattern:$0x73625140] }
  0x36   :  { %253 = vmatpush.msrb.mxu0 %v83_v40  ;;  %272 = vmatpush.msrb.mxu1 %v100_v41  ;;  %v150_v50 = vld.sshfl [vmem:[#allocation1 + $0x18] sm:$0xff pattern:$0x73625140]  ;;  %v98_v52 = vld [vmem:[%s778_s1 + $0x2a0] sm:$0xff]  ;;  %v80_v56 = vld [vmem:[%s778_s1 + $0x210] sm:$0xff] }
  0x37   :  { %293 = vmatpush.msrb.mxu2 %v115_v42  ;;  %312 = vmatpush.msrb.mxu3 %v132_v43  ;;  %v81_v51 = vld [vmem:[%s778_s1 + $0x218] sm:$0xff]  ;;  %v130_v54 = vld [vmem:[%s778_s1 + $0x3a0] sm:$0xff]  ;;  %v148_v55 = vld.sshfl [vmem:[#allocation1 + $0x8] sm:$0xff pattern:$0x73625140] }
  0x38   :  { %219 = vmatmul.f32.vlgmr.msra.gmra.mxu2 %v149_v44  ;;  %254 = vmatpush.msrb.mxu0 %v82_v45  ;;  %v113_v53 = vld [vmem:[%s778_s1 + $0x318] sm:$0xff]  ;;  %v112_v58 = vld [vmem:[%s778_s1 + $0x310] sm:$0xff]  ;;  %v79_v60 = vld [vmem:[%s778_s1 + $0x208] sm:$0xff] }
  0x39   :  { %273 = vmatpush.msrb.mxu1 %v99_v46  ;;  %294 = vmatpush.msrb.mxu2 %v114_v47  ;;  %v97_v57 = vld [vmem:[%s778_s1 + $0x298] sm:$0xff]  ;;  %v96_v61 = vld [vmem:[%s778_s1 + $0x290] sm:$0xff]  ;;  %v111_v62 = vld [vmem:[%s778_s1 + $0x308] sm:$0xff] }
  0x3a   :  { %313 = vmatpush.msrb.mxu3 %v131_v48  ;;  %179 = vmatmul.f32.vlgmr.msra.gmra.mxu0 %v147_v49  ;;  %v129_v59 = vld [vmem:[%s778_s1 + $0x398] sm:$0xff]  ;;  %v128_v63 = vld [vmem:[%s778_s1 + $0x390] sm:$0xff]  ;;  %v78_v0 = vld [vmem:[%s778_s1 + $0x200] sm:$0xff] }
  0x3b   :  { %239 = vmatmul.f32.vlgmr.msra.gmra.mxu3 %v150_v50  ;;  %255 = vmatpush.msrb.mxu0 %v81_v51  ;;  %v95_v1 = vld [vmem:[%s778_s1 + $0x288] sm:$0xff]  ;;  %v110_v2 = vld [vmem:[%s778_s1 + $0x300] sm:$0xff]  ;;  %v153_v5 = vld.sshfl [vmem:[#allocation1 + $0x30] sm:$0xff pattern:$0x73625140] }
  0x3c   :  { %274 = vmatpush.msrb.mxu1 %v98_v52  ;;  %295 = vmatpush.msrb.mxu2 %v113_v53  ;;  %v127_v3 = vld [vmem:[%s778_s1 + $0x388] sm:$0xff]  ;;  %v151_v4 = vld.sshfl [vmem:[#allocation1 + $0x20] sm:$0xff pattern:$0x73625140] }
  0x3d   :  { %314 = vmatpush.msrb.mxu3 %v130_v54  ;;  %199 = vmatmul.f32.vlgmr.msra.gmra.mxu1 %v148_v55  ;;  %v94_v6 = vld [vmem:[%s778_s1 + $0x280] sm:$0xff]  ;;  %v152_v8 = vld.sshfl [vmem:[#allocation1 + $0x28] sm:$0xff pattern:$0x73625140] }
  0x3e   :  { %256 = vmatpush.msrb.mxu0 %v80_v56  ;;  %275 = vmatpush.msrb.mxu1 %v97_v57  ;;  %v126_v7 = vld [vmem:[%s778_s1 + $0x380] sm:$0xff]  ;;  %v154_v9 = vld.sshfl [vmem:[#allocation1 + $0x38] sm:$0xff pattern:$0x73625140]  ;;  %s368_s1 = smov [#allocation2]  }
  0x3f   :  { %296 = vmatpush.msrb.mxu2 %v112_v58  ;;  %315 = vmatpush.msrb.mxu3 %v129_v59  ;;  %s330_s14 = sshll.u32 %s368_s1, 4  ;;  %s331_s14 = int_to_ptr.vmem [resolvable:$true] %s330_s14 }
  0x40   :  { %257 = vmatpush.msrb.mxu0 %v79_v60  ;;  %276 = vmatpush.msrb.mxu1 %v96_v61 }
  0x41   :  { %297 = vmatpush.msrb.mxu2 %v111_v62  ;;  %316 = vmatpush.msrb.mxu3 %v128_v63 }
  0x42   :  { %258 = vmatpush.msrb.mxu0 %v78_v0  ;;  %277 = vmatpush.msrb.mxu1 %v95_v1 }
  0x43   :  { %298 = vmatpush.msrb.mxu2 %v110_v2  ;;  %317 = vmatpush.msrb.mxu3 %v127_v3 }
  0x44   :  { %259 = vmatmul.f32.vlgmr.msrb.gmra.mxu0 %v151_v4  ;;  %299 = vmatmul.f32.vlgmr.msrb.gmra.mxu2 %v153_v5 }
  0x45   :  { %278 = vmatpush.msrb.mxu1 %v94_v6  ;;  %318 = vmatpush.msrb.mxu3 %v126_v7 }
  0x46   :  { %279 = vmatmul.f32.vlgmr.msrb.gmra.mxu1 %v152_v8  ;;  %319 = vmatmul.f32.vlgmr.msrb.gmra.mxu3 %v154_v9 }
  0xb7   :  { %v180_v10 = vpop.f32.mrf.mxu0 }
  0xba   :  { %v200_v11 = vpop.f32.mrf.mxu1 }
  0xbb   :  { %v201_v12 = vadd.f32 %v200_v11, %v180_v10  ;;  %v220_v13 = vpop.f32.mrf.mxu2 }
  0xbd   :  { %v221_v14 = vadd.f32 %v220_v13, %v201_v12 }
  0xbe   :  { %v240_v15 = vpop.f32.mrf.mxu3 }
  0xbf   :  { %v241_v16 = vadd.f32 %v240_v15, %v221_v14 }
  0xc1   :  { %v260_v17 = vpop.f32.mrf.mxu0 }
  0xc2   :  { %v261_v18 = vadd.f32 %v260_v17, %v241_v16 }
  0xc3   :  { %v280_v19 = vpop.f32.mrf.mxu1 }
  0xc4   :  { %v281_v20 = vadd.f32 %v280_v19, %v261_v18 }
  0xc7   :  { %v300_v21 = vpop.f32.mrf.mxu2 }
  0xc8   :  { %v301_v22 = vadd.f32 %v300_v21, %v281_v20 }
  0xc9   :  { %v320_v23 = vpop.f32.mrf.mxu3 }
  0xca   :  { %v321_v24 = vadd.f32 %v320_v23, %v301_v22 }
  0xcc   :  { %324 = vst.msk [vmem:[#allocation2] sm:$0x3] %vm323_vm0, %v321_v24 }
  0xcd   :  { %335 = dma.vmem_to_hbm [thread:$0]  %s331_s14, 32, %s333_s17, [#allocation3]  }
  0xce   :  { %366 = dma.done.wait [#allocation3], 32  }
  0xcf   :  { %367 = vsyncadd [#allocation3], 4294967264 }
  0xd0   :  { %340 = vsyncpa [#allocation3], 1 }

</bundles_post_ra>
